<compile_context>
chip_gen: v6e
topology: v6e:2x2x1
jax: 0.10.0
libtpu: 0.0.40
codegen_flags: <defaults>
</compile_context>

<pallas_src>
import jax
import jax.numpy as jnp
from jax.experimental import pallas as pl
from jax.experimental.pallas import tpu as pltpu


_LANE = 128                        # lane width (last-dim alignment)
_SUBLANE = 8                       # sublane height / row-tile granularity
_TM_MAX = 2048                     # max row tile (sweep 512..4096 on prod shapes)
_VMEM_BUDGET = 48 * 1024 * 1024    # fits v7x (64 MiB physical); fine on v5e/v6e


def _token_selector_kernel(h_ref, w_ref, o_ref):
    # h_ref: (tm, E_pad) hidden-state row tile (native dtype, e.g. bf16/f32)
    # w_ref: (E_pad, 2)  classifier weight, resident across the grid
    # o_ref: (tm, 2)     float32 log-probability tile
    logits = jnp.dot(h_ref[...], w_ref[...],
                     preferred_element_type=jnp.float32)        # (tm, 2) f32
    # Two-class log_softmax in closed form (no XLU reduce over the lane axis):
    #   d = l1 - l0 ; out0 = -softplus(d) ; out1 = -softplus(-d)
    # softplus(x) = max(x, 0) + log1p(exp(-|x|))   (numerically stable)
    l0 = logits[:, 0:1]
    l1 = logits[:, 1:2]
    d = l1 - l0
    s = jnp.log1p(jnp.exp(-jnp.abs(d)))   # shared term, sits in the EUP slot
    m = jnp.maximum(d, 0.0)
    out0 = -(m + s)                       # = -softplus(d)  = log_softmax[..., 0]
    out1 = (d - m) - s                    # = -softplus(-d) = log_softmax[..., 1]
    o_ref[...] = jnp.concatenate([out0, out1], axis=-1).astype(o_ref.dtype)


def _round_up(x, m):
    return ((x + m - 1) // m) * m


def _choose_row_tile(n_rows, e_pad, dtype_bytes):
    # The double-buffered h tile dominates VMEM: keep 2 * tm * e_pad * bytes
    # within ~half the budget (rest: weight, outputs, internal scratch).
    cap = (_VMEM_BUDGET // 2) // (2 * e_pad * dtype_bytes)
    cap = max(_SUBLANE, (cap // _SUBLANE) * _SUBLANE)
    tm = min(_TM_MAX, cap)
    # Keep >= 2 grid steps so both v7x TensorCores are used and the pipeline
    # can overlap the next DMA with the current (cheap) compute.
    half = _round_up(max(1, (n_rows + 1) // 2), _SUBLANE)
    tm = max(_SUBLANE, min(tm, half))
    return tm


def linear_token_selector_forward(hidden_states, weight, *, tm=None):
    """
    hidden_states: (B, S, E) array  (stand-in for encoder(x)['hidden_states'][-1])
    weight:        (2, E)    array  (nn.Linear(E, 2, bias=False).weight)
    returns:       (B, S, 2) float32 log-probabilities
    """
    B, S, E = hidden_states.shape
    n_rows = B * S
    dtype = hidden_states.dtype
    dtype_bytes = jnp.dtype(dtype).itemsize

    # Lane-pad the embedding axis so every vld is full width.
    e_pad = _round_up(E, _LANE)

    h2d = hidden_states.reshape(n_rows, E)
    w_t = weight.T.astype(dtype)                    # (E, 2), same MXU input dtype
    if e_pad != E:
        h2d = jnp.pad(h2d, ((0, 0), (0, e_pad - E)))
        w_t = jnp.pad(w_t, ((0, e_pad - E), (0, 0)))

    if tm is None:
        tm = _choose_row_tile(n_rows, e_pad, dtype_bytes)

    # Ragged tail: pad rows up to a multiple of tm; padded rows just produce
    # the constant log(1/2) and are sliced off below.
    grid_m = pl.cdiv(n_rows, tm)
    rows_pad = grid_m * tm
    if rows_pad != n_rows:
        h2d = jnp.pad(h2d, ((0, rows_pad - n_rows), (0, 0)))

    cost = pl.CostEstimate(
        flops=2 * rows_pad * e_pad * 2,
        transcendentals=2 * rows_pad,
        bytes_accessed=(rows_pad * e_pad * dtype_bytes       # h read
                        + e_pad * 2 * dtype_bytes            # weight read
                        + rows_pad * 2 * 4),                 # f32 output write
    )

    out2d = pl.pallas_call(
        _token_selector_kernel,
        out_shape=jax.ShapeDtypeStruct((rows_pad, 2), jnp.float32),
        grid_spec=pltpu.PrefetchScalarGridSpec(
            num_scalar_prefetch=0,
            grid=(grid_m,),
            in_specs=[
                pl.BlockSpec((tm, e_pad), lambda i: (i, 0)),   # hidden-state tile
                pl.BlockSpec((e_pad, 2), lambda i: (0, 0)),    # resident weight
            ],
            out_specs=pl.BlockSpec((tm, 2), lambda i: (i, 0)),
        ),
        compiler_params=pltpu.CompilerParams(
            dimension_semantics=("parallel",),
            vmem_limit_bytes=_VMEM_BUDGET,
        ),
        cost_estimate=cost,
    )(h2d, w_t)

    return out2d[:n_rows].reshape(B, S, 2)


def _reference_forward(hidden_states, weight):
    logits = jnp.einsum("bse,ce->bsc", hidden_states, weight)
    return jax.nn.log_softmax(logits, axis=2)


if __name__ == "__main__":
    B, S, E = 2, 8, 32  # batch, seq_len, embedding_size

    key = jax.random.PRNGKey(0)
    k_h, k_w = jax.random.split(key)

    # Synthetic stand-in for encoder(x)['hidden_states'][-1]
    hidden_states = jax.random.normal(k_h, (B, S, E), dtype=jnp.float32)
    # Deterministic classifier weight: nn.Linear(E, 2, bias=False).weight -> (2, E)
    classifier_weight = jax.random.normal(k_w, (2, E), dtype=jnp.float32) * 0.02

    out = linear_token_selector_forward(hidden_states, classifier_weight)
    out = jax.block_until_ready(out)

    ref = _reference_forward(hidden_states, classifier_weight)
    assert out.shape == (B, S, 2)
    assert out.dtype == jnp.float32
    assert jnp.allclose(out, ref, atol=1e-5, rtol=1e-5), "mismatch vs reference"

    print("KERNEL_OK")
</pallas_src>

<mosaic_0001>
module attributes {stable_mosaic.version = 11 : i64} {
  func.func @_token_selector_kernel(%arg0: i32, %arg1: memref<8x128xf32, #tpu.memory_space<vmem>>, %arg2: memref<128x2xf32, #tpu.memory_space<vmem>>, %arg3: memref<8x2xf32, #tpu.memory_space<vmem>>) attributes {dimension_semantics = [#tpu.dimension_semantics<parallel>], iteration_bounds = array<i64: 2>, scalar_prefetch = 0 : i64, scratch_operands = 0 : i64, tpu.core_type = #tpu.core_type<tc>, window_params = [{transform_indices = @transform_0, window_bounds = array<i64: 8, 128>}, {pipeline_mode = #tpu.pipeline_mode<synchronous>, transform_indices = @transform_1, window_bounds = array<i64: 128, 2>}, {transform_indices = @transform_2, window_bounds = array<i64: 8, 2>}]} {
    %c0 = arith.constant 0 : index
    %c0_0 = arith.constant 0 : index
    %0 = vector.load %arg1[%c0, %c0_0] : memref<8x128xf32, #tpu.memory_space<vmem>>, vector<8x128xf32>
    %c0_1 = arith.constant 0 : index
    %c0_2 = arith.constant 0 : index
    %1 = vector.load %arg2[%c0_1, %c0_2] : memref<128x2xf32, #tpu.memory_space<vmem>>, vector<128x2xf32>
    %cst = arith.constant dense<0.000000e+00> : vector<8x2xf32>
    %2 = tpu.matmul %0, %1, %cst {dimension_numbers = #tpu.dot_dimension_numbers<[1], [0], [0], [1], [0, 0, 1, 1], [], []>} : vector<8x128xf32>, vector<128x2xf32>, vector<8x2xf32> -> vector<8x2xf32>
    %3 = vector.extract_strided_slice %2 {offsets = [0, 0], sizes = [8, 1], strides = [1, 1]} : vector<8x2xf32> to vector<8x1xf32>
    %4 = vector.extract_strided_slice %2 {offsets = [0, 1], sizes = [8, 1], strides = [1, 1]} : vector<8x2xf32> to vector<8x1xf32>
    %5 = arith.subf %4, %3 : vector<8x1xf32>
    %6 = math.absf %5 : vector<8x1xf32>
    %cst_3 = arith.constant 0.000000e+00 : f32
    %7 = vector.broadcast %cst_3 : f32 to vector<8x1xf32>
    %8 = arith.subf %7, %6 : vector<8x1xf32>
    %9 = math.exp %8 : vector<8x1xf32>
    %10 = math.log1p %9 : vector<8x1xf32>
    %cst_4 = arith.constant 0.000000e+00 : f32
    %11 = vector.broadcast %cst_4 : f32 to vector<8x1xf32>
    %12 = arith.maximumf %5, %11 : vector<8x1xf32>
    %13 = arith.addf %12, %10 : vector<8x1xf32>
    %cst_5 = arith.constant 0.000000e+00 : f32
    %14 = vector.broadcast %cst_5 : f32 to vector<8x1xf32>
    %15 = arith.subf %14, %13 : vector<8x1xf32>
    %16 = arith.subf %5, %12 : vector<8x1xf32>
    %17 = arith.subf %16, %10 : vector<8x1xf32>
    %18 = tpu.concatenate %15, %17 in 1 : vector<8x1xf32>, vector<8x1xf32> -> vector<8x2xf32>
    %c0_6 = arith.constant 0 : index
    %c0_7 = arith.constant 0 : index
    %19 = vector.load %arg3[%c0_6, %c0_7] : memref<8x2xf32, #tpu.memory_space<vmem>>, vector<8x2xf32>
    tpu.vector_store %arg3[%c0_6, %c0_7], %18 {strides = array<i32>} : memref<8x2xf32, #tpu.memory_space<vmem>>, vector<8x2xf32>,
    return
  }
  func.func @transform_0(%arg0: i32) -> (i32, i32) {
    %c0_i32 = arith.constant 0 : i32
    %c0_i32_0 = arith.constant 0 : i32
    return %arg0, %c0_i32 : i32, i32
  }
  func.func @transform_1(%arg0: i32) -> (i32, i32) {
    %c0_i32 = arith.constant 0 : i32
    %c0_i32_0 = arith.constant 0 : i32
    %c0_i32_1 = arith.constant 0 : i32
    return %c0_i32, %c0_i32_0 : i32, i32
  }
  func.func @transform_2(%arg0: i32) -> (i32, i32) {
    %c0_i32 = arith.constant 0 : i32
    %c0_i32_0 = arith.constant 0 : i32
    return %arg0, %c0_i32 : i32, i32
  }
}

</mosaic_0001>

<bundles_post_ra>
// kernel: tpu_custom_call.1
= control target key start
LH: loop header
LB: loop body
LE: loop exit
PB: predicated region body
PF: predicated region fallthrough
CT: control target
= control target key end

     0   :  { %s414_s9 = smov 0   ;;  %s490_s0 = inlined_call_operand.vmem [shape: f32[16,128], index: 0, kind: input, shape index: {}]   ;;  %s491_s1 = inlined_call_operand.vmem [shape: f32[128,2], index: 1, kind: input, shape index: {}]   ;;  %s492_s2 = inlined_call_operand.vmem [shape: f32[16,2], index: 2, kind: output, shape index: {}]  }
   0x1 LB: > { %s310_s10 = sadd.s32 4294967295, %s393_s9   ;;  %p314_p0 = scmp.ge.s32.totalorder %s393_s9, 1  ;;  %s393_s9 = sphi %s414_s9, %s12_s9  }
   0x2   : > { %p111_p1 = scmp.lt.s32.totalorder %s393_s9, 3 }
   0x4   : > { %p112_p2 = pnand %p314_p0, %p111_p1 }
   0x5   : > { %p131_p3 = scmp.lt.s32.totalorder (!%p112_p2), %s310_s10, 1  ;;  %s397_s21 = smov (!%p112_p2), 1  }
   0x6   : > { %115 = sbr.rel (%p112_p2) target bundleno = 514 (0x202), region = 28  ;;  %s398_s22 = smov (!%p112_p2), 127  }
   0xb   : > { %v155_v0 = vld [vmem:[%s491_s1 + $0x78] sm:$0xff]  ;;  %v395_v1 = vmov 0.0   ;;  %v154_v2 = vld [vmem:[%s491_s1 + $0x70] sm:$0xff]  ;;  %vm396_vm0 = vmmov 0   ;;  %v153_v3 = vld [vmem:[%s491_s1 + $0x68] sm:$0xff]  ;;  %s494_s10 = smov (!%p131_p3, %s310_s10), 1 }
   0xc   : > { %336 = vmatprep.subr.mxu0 %v395_v1  ;;  %368 = vmatprep.mubr.msk.f32.mxu0 %vm396_vm0, %v395_v1  ;;  %v152_v4 = vld [vmem:[%s491_s1 + $0x60] sm:$0xff]  ;;  %v151_v5 = vld [vmem:[%s491_s1 + $0x58] sm:$0xff]  ;;  %v150_v6 = vld [vmem:[%s491_s1 + $0x50] sm:$0xff]  ;;  %s315_s11 = sshll.u32 %s494_s10, 3  ;;  %vm253_vm2 = vcmask 7168   ;;  %vm255_vm3 = vcmask 15360  }
   0xd   : > { %337 = vmatpush3.msra.mxu0 %v155_v0  ;;  %v149_v7 = vld [vmem:[%s491_s1 + $0x48] sm:$0xff]  ;;  %v148_v8 = vld [vmem:[%s491_s1 + $0x40] sm:$0xff]  ;;  %v147_v9 = vld [vmem:[%s491_s1 + $0x38] sm:$0xff]  ;;  %s134_s18 = scalar_lea.vmem %s490_s0, %s315_s11  ;;  %s138_s25 = scalar_lea.vmem %s492_s2, %s315_s11 }
   0xe   : > { %338 = vmatprep.subr.mxu0 %v395_v1  ;;  %v146_v10 = vld [vmem:[%s491_s1 + $0x30] sm:$0xff]  ;;  %v145_v11 = vld [vmem:[%s491_s1 + $0x28] sm:$0xff]  ;;  %v144_v12 = vld [vmem:[%s491_s1 + $0x20] sm:$0xff] }
   0xf   : > { %339 = vmatpush3.msra.mxu0 %v154_v2  ;;  %v143_v13 = vld [vmem:[%s491_s1 + $0x18] sm:$0xff]  ;;  %v142_v14 = vld [vmem:[%s491_s1 + $0x10] sm:$0xff]  ;;  %v141_v15 = vld [vmem:[%s491_s1 + $0x8] sm:$0xff] }
  0x10   : > { %340 = vmatprep.subr.mxu0 %v395_v1  ;;  %v140_v16 = vld [vmem:[%s491_s1] sm:$0xff] }
  0x11   : > { %341 = vmatpush3.msra.mxu0 %v153_v3  ;;  %v139_v17 = vld [vmem:[%s134_s18] sm:$0xff] }
  0x12   : > { %342 = vmatprep.subr.mxu0 %v395_v1 }
  0x13   : > { %343 = vmatpush3.msra.mxu0 %v152_v4 }
  0x14   : > { %344 = vmatprep.subr.mxu0 %v395_v1 }
  0x15   : > { %345 = vmatpush3.msra.mxu0 %v151_v5 }
  0x16   : > { %346 = vmatprep.subr.mxu0 %v395_v1 }
  0x17   : > { %347 = vmatpush3.msra.mxu0 %v150_v6 }
  0x18   : > { %348 = vmatprep.subr.mxu0 %v395_v1 }
  0x19   : > { %349 = vmatpush3.msra.mxu0 %v149_v7 }
  0x1a   : > { %350 = vmatprep.subr.mxu0 %v395_v1 }
  0x1b   : > { %351 = vmatpush3.msra.mxu0 %v148_v8 }
  0x1c   : > { %352 = vmatprep.subr.mxu0 %v395_v1 }
  0x1d   : > { %353 = vmatpush3.msra.mxu0 %v147_v9 }
  0x1e   : > { %354 = vmatprep.subr.mxu0 %v395_v1 }
  0x1f   : > { %355 = vmatpush3.msra.mxu0 %v146_v10 }
  0x20   : > { %356 = vmatprep.subr.mxu0 %v395_v1 }
  0x21   : > { %357 = vmatpush3.msra.mxu0 %v145_v11 }
  0x22   : > { %358 = vmatprep.subr.mxu0 %v395_v1 }
  0x23   : > { %359 = vmatpush3.msra.mxu0 %v144_v12 }
  0x24   : > { %360 = vmatprep.subr.mxu0 %v395_v1 }
  0x25   : > { %361 = vmatpush3.msra.mxu0 %v143_v13 }
  0x26   : > { %362 = vmatprep.subr.mxu0 %v395_v1 }
  0x27   : > { %363 = vmatpush3.msra.mxu0 %v142_v14 }
  0x28   : > { %364 = vmatprep.subr.mxu0 %v395_v1 }
  0x29   : > { %365 = vmatpush3.msra.mxu0 %v141_v15 }
  0x2a   : > { %366 = vmatprep.subr.mxu0 %v395_v1 }
  0x2b   : > { %367 = vmatpush3.msra.mxu0 %v140_v16 }
  0x2c   : > { %369 = vmatmul.mubr.f32.vlgmr.msra.gmra.mxu0 %v139_v17 }
  0xec   : > { %v222_v18 = vpop.f32.mrf.mxu0 }
  0xed   : > { %227 = vrot.lane.b32.xlu0 %v222_v18, %s397_s21 }
  0xee   : > { %v370_v19 = vpop.f32.mrf.mxu0 }
 0x15f   : > { %v228_v20 = vpop.permute.xlu0 %227 }
 0x160   : > { %v230_v21 = vsub.f32 %v222_v18, %v228_v20 }
 0x162   : > { %v231_v22 = vand.u32 2147483647, %v230_v21  ;;  %v244_v23 = vmax.f32 %v230_v21, 0.0 }
 0x164   : > { %v232_v24 = vsub.f32 0.0, %v231_v22  ;;  %v247_v25 = vsub.f32 %v230_v21, %v244_v23 }
 0x166   : > { %v233_v26 = vmul.f32 1.442695, %v232_v24 }
 0x168   : > { %383 = vpow2.f32 %v233_v26 }
 0x175   : > { %v384_v27 = vpop.eup %383 }
 0x176   : > { %v235_v28 = vadd.f32 1.0, %v384_v27  ;;  %v238_v29 = vmul.f32 -0.5, %v384_v27  ;;  %v241_v31 = vand.u32 2147483647, %v384_v27 }
 0x178   : > { %385 = vlog2.f32 %v235_v28  ;;  %v239_v30 = vadd.f32 1.0, %v238_v29  ;;  %vm242_vm1 = vcmp.lt.f32.partialorder %v241_v31, 0.0004427343 }
 0x17a   : > { %v240_v34 = vmul.f32 %v384_v27, %v239_v30 }
 0x185   : > { %v386_v32 = vpop.eup %385 }
 0x186   : > { %v237_v33 = vmul.f32 0.6931472, %v386_v32 }
 0x188   : > { %v243_v35 = vsel %vm242_vm1, %v240_v34, %v237_v33 }
 0x189   : > { %v245_v36 = vadd.f32 %v244_v23, %v243_v35  ;;  %v248_v37 = vsub.f32 %v247_v25, %v243_v35 }
 0x18b   : > { %v246_v38 = vsub.f32 0.0, %v245_v36 }
 0x18d   : > { %250 = vrot.lane.b32.xlu0 %v246_v38, %s398_s22 }
 0x1ff   : > { %v251_v39 = vpop.permute.xlu0 %250 }
 0x200   : > { %v254_v40 = vsel %vm253_vm2, %v251_v39, %v248_v37 }
 0x201   : > { %256 = vst.msk [vmem:[%s138_s25] sm:$0xff] %vm255_vm3, %v254_v40 }
 0x202 PF: > { %s12_s9 = sadd.s32 1, %s393_s9  }
 0x203   : > { %p9_p4 = scmp.ge.s32.totalorder %s12_s9, 4  }
 0x205   :  { %11 = sbr.rel (!%p9_p4) target bundleno = 1 (0x1), region = 58 }

</bundles_post_ra>
